<compile_context>
chip_gen: v5e
topology: v5e:2x2
jax: 0.10.0
libtpu: 0.0.40
codegen_flags: <defaults>
</compile_context>

<pallas_src>
import jax
import jax.numpy as jnp
from jax import lax
from jax.experimental import pallas as pl
from jax.experimental.pallas import tpu as pltpu

_LANES = 128       # lane-dense last dim (one full vreg width)
_SUBLANES = 8
_SLICE_ROWS = 256  # rows per inner-loop slice (128 KiB f32 of product, max)


def _clip_loss_kernel(y_ref, z_ref, out_ref):
    b = pl.program_id(1)  # streamed reduction axis within this chunk

    @pl.when(b == 0)
    def _():
        out_ref[...] = jnp.zeros(out_ref.shape, jnp.float32)

    bn = y_ref.shape[0]
    # Static slice size that divides bn (bn is always a multiple of 8).
    s = min(_SLICE_ROWS, bn)
    while bn % s:
        s -= _SUBLANES

    def body(i, acc):
        start = pl.multiple_of(i * s, s)
        y = y_ref[pl.ds(start, s), :].astype(jnp.float32)
        z = z_ref[pl.ds(start, s), :].astype(jnp.float32)
        prod = y * z
        # (s,128) -> (s//8, 8, 128) is tile-aligned; summing the leading
        # vreg-group axis is plain VPU adds -> no XLU in the hot loop.
        return acc + jnp.sum(prod.reshape(s // _SUBLANES, _SUBLANES, _LANES),
                             axis=0)

    partial = lax.fori_loop(
        0, bn // s, body,
        jnp.zeros((_SUBLANES, _LANES), jnp.float32),
        unroll=True)

    # Output block is resident across the inner axis -> accumulate in place.
    out_ref[0] += partial


def clip_loss_orig2(Y: jax.Array, Z: jax.Array, *, block_rows: int = 8192,
                    num_chunks: int = 2) -> jax.Array:
    """Pallas implementation of CLIPLossOrig2.forward (returns term_1.mean())."""
    assert Y.shape == Z.shape
    N = Y.shape[0]
    total = int(Y.size)
    itemsize = jnp.dtype(Y.dtype).itemsize

    # Zero-cost flattening (contiguous ravel is a bitcast).
    y_flat = jnp.ravel(Y)
    z_flat = jnp.ravel(Z)

    rows = total // _LANES                      # full 128-lane rows

    # Block rows: forced to a multiple of 8 regardless of caller input.
    bn = (min(block_rows, rows) // _SUBLANES) * _SUBLANES
    bn = max(bn, _SUBLANES)

    chunks = max(1, int(num_chunks))
    if rows // (bn * chunks) == 0:
        chunks = 1                              # not enough blocks to split

    # Kernel covers the largest prefix that is an exact multiple of bn*chunks
    # rows (balanced chunks, no padding, no round-up). Everything else (< one
    # block per chunk, plus the <128-element tail) goes through a tiny vdot.
    rows_main = (rows // (bn * chunks)) * (bn * chunks)
    main_elems = rows_main * _LANES

    if main_elems < total:
        tail_sum = jnp.vdot(y_flat[main_elems:].astype(jnp.float32),
                            z_flat[main_elems:].astype(jnp.float32))
    else:
        tail_sum = jnp.float32(0.0)

    if rows_main == 0:
        # Input too small for even one (8,128) block: pure wrapper path.
        return -tail_sum / N

    blocks_per_chunk = rows_main // (bn * chunks)

    if main_elems == total:
        # Pure reshape — zero-copy.
        y2 = y_flat.reshape(rows_main, _LANES)
        z2 = z_flat.reshape(rows_main, _LANES)
    else:
        # 128-aligned prefix (contiguous leading slice) + reshape.
        y2 = lax.slice(y_flat, (0,), (main_elems,)).reshape(rows_main, _LANES)
        z2 = lax.slice(z_flat, (0,), (main_elems,)).reshape(rows_main, _LANES)

    # Explicit VMEM budget: 2 inputs x 2 pipeline buffers (+ headroom for the
    # tiny output block). Covers the default bn=8192 even on v5e's 16 MiB
    # scoped default; stays well inside v7x's 64 MiB physical VMEM per TC.
    footprint = 2 * 2 * bn * _LANES * itemsize
    vmem_limit = int(min(max(footprint + (4 << 20), 16 << 20), 100 << 20))

    cost = pl.CostEstimate(
        flops=2 * main_elems,
        transcendentals=0,
        bytes_accessed=2 * main_elems * itemsize
        + chunks * _SUBLANES * _LANES * 4,
    )

    partials = pl.pallas_call(
        _clip_loss_kernel,
        out_shape=jax.ShapeDtypeStruct((chunks, _SUBLANES, _LANES),
                                       jnp.float32),
        grid_spec=pltpu.PrefetchScalarGridSpec(
            num_scalar_prefetch=0,
            grid=(chunks, blocks_per_chunk),
            in_specs=[
                pl.BlockSpec((bn, _LANES),
                             lambda c, b: (c * blocks_per_chunk + b, 0)),
                pl.BlockSpec((bn, _LANES),
                             lambda c, b: (c * blocks_per_chunk + b, 0)),
            ],
            # Full (8,128) output tile per chunk -> unmasked stores; the
            # cross-sublane/lane reduce happens once, in the wrapper.
            out_specs=pl.BlockSpec((1, _SUBLANES, _LANES),
                                   lambda c, b: (c, 0, 0)),
        ),
        compiler_params=pltpu.CompilerParams(
            # Chunk axis is independent (megacore split on v7x); inner axis is
            # the streamed reduction over the resident output accumulator.
            dimension_semantics=("parallel", "arbitrary"),
            vmem_limit_bytes=vmem_limit,
        ),
        cost_estimate=cost,
    )(y2, z2)

    # TODO(synk): the reference also computes term_2 (log-sum-exp of cross
    # inner products) but never uses it in the returned value, so only
    # term_1.mean() is reproduced here.

    return -(jnp.sum(partials) + tail_sum) / N


if __name__ == "__main__":
    key = jax.random.PRNGKey(0)
    k1, k2, k3, k4, k5, k6 = jax.random.split(key, 6)

    def ref_loss(Y, Z):
        return -jnp.mean(jnp.einsum('nft,nft->n', Z, Y))

    # Lane-aligned small shape: whole reduction runs inside the kernel
    # (zero-copy reshape, grid = (2 chunks, 1 block)).
    N, F, T = 2, 16, 128
    Y = jax.random.normal(k1, (N, F, T), dtype=jnp.float32)
    Z = jax.random.normal(k2, (N, F, T), dtype=jnp.float32)
    out = jax.block_until_ready(clip_loss_orig2(Y, Z, block_rows=16))
    assert jnp.allclose(out, ref_loss(Y, Z), rtol=1e-5, atol=1e-4), (
        out, ref_loss(Y, Z))

    # Ragged shape: exercises the kernel main region (grid (2,2)) plus the
    # wrapper-handled remainder rows and <128-element tail.
    N2, F2, T2 = 4, 33, 257
    Y2 = jax.random.normal(k3, (N2, F2, T2), dtype=jnp.float32)
    Z2 = jax.random.normal(k4, (N2, F2, T2), dtype=jnp.float32)
    out2 = jax.block_until_ready(clip_loss_orig2(Y2, Z2, block_rows=64))
    assert jnp.allclose(out2, ref_loss(Y2, Z2), rtol=1e-5, atol=1e-3), (
        out2, ref_loss(Y2, Z2))

    # Tiny shape (< 8 lane-rows): pure wrapper fallback path, default params.
    N3, F3, T3 = 2, 4, 8
    Y3 = jax.random.normal(k5, (N3, F3, T3), dtype=jnp.float32)
    Z3 = jax.random.normal(k6, (N3, F3, T3), dtype=jnp.float32)
    out3 = jax.block_until_ready(clip_loss_orig2(Y3, Z3))
    assert jnp.allclose(out3, ref_loss(Y3, Z3), rtol=1e-5, atol=1e-4), (
        out3, ref_loss(Y3, Z3))

    print("KERNEL_OK")
</pallas_src>

<mosaic_0001>
module attributes {stable_mosaic.version = 11 : i64} {
  func.func @_clip_loss_kernel(%arg0: i32, %arg1: i32, %arg2: memref<16x128xf32, #tpu.memory_space<vmem>>, %arg3: memref<16x128xf32, #tpu.memory_space<vmem>>, %arg4: memref<1x8x128xf32, #tpu.memory_space<vmem>>) attributes {dimension_semantics = [#tpu.dimension_semantics<parallel>, #tpu.dimension_semantics<arbitrary>], iteration_bounds = array<i64: 2, 1>, scalar_prefetch = 0 : i64, scratch_operands = 0 : i64, tpu.core_type = #tpu.core_type<tc>, window_params = [{transform_indices = @transform_0, window_bounds = array<i64: 16, 128>}, {transform_indices = @transform_1, window_bounds = array<i64: 16, 128>}, {transform_indices = @transform_2, window_bounds = array<i64: 1, 8, 128>}]} {
    %c0_i32 = arith.constant 0 : i32
    %0 = arith.cmpi eq, %arg1, %c0_i32 : i32
    %1 = arith.extui %0 : i1 to i32
    %c0_i32_0 = arith.constant 0 : i32
    %2 = arith.cmpi ne, %1, %c0_i32_0 : i32
    scf.if %2 {
      %cst_10 = arith.constant 0.000000e+00 : f32
      %20 = vector.broadcast %cst_10 : f32 to vector<1x8x128xf32>
      %c0_11 = arith.constant 0 : index
      %c0_12 = arith.constant 0 : index
      %c0_13 = arith.constant 0 : index
      %21 = vector.load %arg4[%c0_11, %c0_12, %c0_13] : memref<1x8x128xf32, #tpu.memory_space<vmem>>, vector<1x8x128xf32>
      tpu.vector_store %arg4[%c0_11, %c0_12, %c0_13], %20 {strides = array<i32>} : memref<1x8x128xf32, #tpu.memory_space<vmem>>, vector<1x8x128xf32>,
    } else {
    }
    %cst = arith.constant 0.000000e+00 : f32
    %3 = vector.broadcast %cst : f32 to vector<8x128xf32>
    %c0_i32_1 = arith.constant 0 : i32
    %c16_i32 = arith.constant 16 : i32
    %4 = arith.muli %c0_i32_1, %c16_i32 : i32
    %5 = tpu.assume_multiple %4, 16 : i32
    %6 = arith.index_cast %5 : i32 to index
    %c0 = arith.constant 0 : index
    %7 = vector.load %arg2[%6, %c0] : memref<16x128xf32, #tpu.memory_space<vmem>>, vector<16x128xf32>
    %8 = arith.index_cast %5 : i32 to index
    %c0_2 = arith.constant 0 : index
    %9 = vector.load %arg3[%8, %c0_2] : memref<16x128xf32, #tpu.memory_space<vmem>>, vector<16x128xf32>
    %10 = arith.mulf %7, %9 : vector<16x128xf32>
    %11 = vector.shape_cast %10 : vector<16x128xf32> to vector<2x8x128xf32>
    %cst_3 = arith.constant dense<0.000000e+00> : vector<8x128xf32>
    %12 = vector.multi_reduction <add>, %11, %cst_3 [0] : vector<2x8x128xf32> to vector<8x128xf32>
    %13 = arith.addf %3, %12 : vector<8x128xf32>
    %c1_i32 = arith.constant 1 : i32
    %c0_4 = arith.constant 0 : index
    %c0_5 = arith.constant 0 : index
    %c0_6 = arith.constant 0 : index
    %14 = vector.load %arg4[%c0_4, %c0_5, %c0_6] : memref<1x8x128xf32, #tpu.memory_space<vmem>>, vector<1x8x128xf32>
    %15 = vector.shape_cast %14 : vector<1x8x128xf32> to vector<8x128xf32>
    %16 = arith.addf %15, %13 : vector<8x128xf32>
    %c0_7 = arith.constant 0 : index
    %c0_8 = arith.constant 0 : index
    %c0_9 = arith.constant 0 : index
    %17 = vector.load %arg4[%c0_7, %c0_8, %c0_9] : memref<1x8x128xf32, #tpu.memory_space<vmem>>, vector<1x8x128xf32>
    %18 = vector.shape_cast %17 : vector<1x8x128xf32> to vector<8x128xf32>
    %19 = vector.shape_cast %16 : vector<8x128xf32> to vector<1x8x128xf32>
    tpu.vector_store %arg4[%c0_7, %c0_8, %c0_9], %19 {strides = array<i32>} : memref<1x8x128xf32, #tpu.memory_space<vmem>>, vector<1x8x128xf32>,
    return
  }
  func.func @transform_0(%arg0: i32, %arg1: i32) -> (i32, i32) {
    %c1_i32 = arith.constant 1 : i32
    %0 = arith.muli %arg0, %c1_i32 : i32
    %1 = arith.addi %0, %arg1 : i32
    %c0_i32 = arith.constant 0 : i32
    %c0_i32_0 = arith.constant 0 : i32
    return %1, %c0_i32 : i32, i32
  }
  func.func @transform_1(%arg0: i32, %arg1: i32) -> (i32, i32) {
    %c1_i32 = arith.constant 1 : i32
    %0 = arith.muli %arg0, %c1_i32 : i32
    %1 = arith.addi %0, %arg1 : i32
    %c0_i32 = arith.constant 0 : i32
    %c0_i32_0 = arith.constant 0 : i32
    return %1, %c0_i32 : i32, i32
  }
  func.func @transform_2(%arg0: i32, %arg1: i32) -> (i32, i32, i32) {
    %c0_i32 = arith.constant 0 : i32
    %c0_i32_0 = arith.constant 0 : i32
    %c0_i32_1 = arith.constant 0 : i32
    return %arg0, %c0_i32, %c0_i32_0 : i32, i32, i32
  }
}

</mosaic_0001>

<bundles_post_ra>
// kernel: tpu_custom_call.1
= control target key start
LH: loop header
LB: loop body
LE: loop exit
PB: predicated region body
PF: predicated region fallthrough
CT: control target
= control target key end

     0   :  { %7 = vsyncpa [#allocation3], 0  ;;  %s760_s0 = inlined_call_operand.hbm [shape: f32[32,128], index: 0, kind: input, shape index: {}]   ;;  %s761_s1 = inlined_call_operand.hbm [shape: f32[32,128], index: 1, kind: input, shape index: {}]   ;;  %s762_s2 = inlined_call_operand.hbm [shape: f32[2,8,128], index: 2, kind: output, shape index: {}]  }
   0x1   :  { %9 = vsyncpa [#allocation3 + $0x1], 0 }
   0x2   :  { %10 = vsyncpa [#allocation6], 0 }
   0x3   :  { %12 = vsyncpa [#allocation6 + $0x1], 0 }
   0x4   :  { %13 = vsyncpa [#allocation4], 0 }
   0x5   :  { %15 = vsyncpa [#allocation4 + $0x1], 0  ;;  %s618_s9 = smov 0   ;;  %s620_s10 = smov 0  }
   0x6   :  { %s622_s11 = smov 0   ;;  %s624_s12 = smov 0  }
   0x7   :  { %s626_s13 = smov 0   ;;  %s628_s14 = smov 0  }
   0x8 LB: > { %s363_s15 = sadd.s32 4294967295, %s599_s14   ;;  %s364_s16 = sadd.s32 4294967294, %s599_s14   ;;  %s599_s14 = sphi %s628_s14, %s21_s14   ;;  %s595_s13 = sphi %s626_s13, %s772_s13   ;;  %s591_s12 = sphi %s624_s12, %s771_s12   ;;  %s587_s11 = sphi %s622_s11, %s770_s11   ;;  %s583_s10 = sphi %s620_s10, %s769_s10   ;;  %s579_s9 = sphi %s618_s9, %s768_s9  }
   0x9   : > { %s33_s17 = sadd.s32 1, %s595_s13  ;;  %s42_s18 = sadd.s32 1, %s587_s11 }
   0xa   : > { %p35_p0 = scmp.ge.s32.totalorder %s33_s17, 2  ;;  %p49_p1 = scmp.ne.s32.totalorder %s587_s11, %s583_s10 }
   0xb   : > { %p50_p2 = scmp.eq.s32.totalorder %s599_s14, 0  ;;  %p55_p3 = scmp.ne.s32.totalorder %s583_s10, %s579_s9 }
   0xc   : > { %s774_s17 = smov (%p35_p0, %s33_s17), 0  ;;  %p56_p5 = scmp.eq.s32.totalorder %s363_s15, 0 }
   0xd   : > { %p659_p4 = por %p50_p2, %p49_p1  ;;  %s39_s20 = ssub.s32 %s595_s13, %s774_s17 }
   0xe   : > { %p107_p6 = scmp.eq.s32.totalorder %s363_s15, 1  ;;  %p40_p7 = scmp.eq.s32.totalorder %s39_s20, 0 }
   0xf   : > { %p665_p8 = por %p56_p5, %p55_p3  ;;  %p113_p10 = scmp.eq.s32.totalorder %s364_s16, 1 }
  0x10   : > { %p669_p9 = por %p107_p6, %p49_p1  ;;  %p366_p12 = scmp.ge.s32.totalorder %s599_s14, 2 }
  0x11   : > { %s674_s23 = scalar_select %p40_p7, %s587_s11, %s42_s18  }
  0x12   : > { %p676_p11 = por %p113_p10, %p55_p3  ;;  %p400_p13 = scmp.lt.s32.totalorder %s599_s14, 2 }
  0x13   : > { %s683_s25 = sand.u32 1, %s587_s11   ;;  %s381_s27 = sshll.u32 %s595_s13, 4 }
  0x14   : > { %s367_s26 = sshll.u32 %s683_s25, 4  ;;  %s143_s30 = scalar_lea.hbm %s760_s0, %s381_s27 }
  0x15   : > { %s137_s3 = scalar_lea.vmem [#allocation2], %s367_s26  ;;  %s144_s5 = sshll.u32 %s143_s30, 4  ;;  %s145_s5 = int_to_ptr.hbm [resolvable:$true] %s144_s5 }
  0x16   : > { %s146_s4 = sshll.u32 %s137_s3, 4  ;;  %p692_p0 = pnand %p400_p13, %p659_p4  ;;  %s147_s4 = int_to_ptr.vmem [resolvable:$true] %s146_s4 }
  0x17   : > { %p373_p1 = scmp.ge.s32.totalorder %s599_s14, 1  ;;  %s134_s7 = scalar_lea.sflag [#allocation3], %s683_s25 }
  0x18   : > { %s601_s8 = smov 128   ;;  %s602_s15 = smov 8  }
  0x19   : > { %392 = dma.hbm_to_vmem [thread:$0]  (!%p692_p0), %s145_s5, 256, %s147_s4, %s134_s7, %s601_s8, %s601_s8, %s602_s15  }
  0x1a   : > { %p177_p2 = scmp.lt.s32.totalorder %s599_s14, 3  ;;  %s166_s20 = scalar_lea.hbm %s761_s1, %s381_s27 }
  0x1b   : > { %s167_s28 = sshll.u32 %s166_s20, 4  ;;  %s160_s19 = scalar_lea.vmem [#allocation5], %s367_s26  ;;  %s168_s28 = int_to_ptr.hbm [resolvable:$true] %s167_s28 }
  0x1c   : > { %p178_p3 = pnand %p373_p1, %p177_p2  ;;  %s169_s29 = sshll.u32 %s160_s19, 4  ;;  %s170_s29 = int_to_ptr.vmem [resolvable:$true] %s169_s29 }
  0x1d   : > { %s157_s30 = scalar_lea.sflag [#allocation6], %s683_s25  ;;  %s708_s3 = sand.u32 (!%p178_p3), 1, %s583_s10  }
  0x1e   : > { %395 = dma.hbm_to_vmem [thread:$0]  (!%p692_p0), %s168_s28, 256, %s170_s29, %s157_s30, %s601_s8, %s601_s8, %s602_s15  }
  0x1f   : > { %181 = sbr.rel (%p178_p3) target bundleno = 54 (0x36), region = 28  ;;  %s374_s4 = sshll.u32 (!%p178_p3), %s708_s3, 4 }
  0x20   : > { %s184_s5 = scalar_lea.sflag (!%p178_p3), [#allocation3], %s708_s3  ;;  %s187_s7 = scalar_lea.vmem (!%p178_p3), [#allocation2], %s374_s4 }
  0x24   : > { %566 = dma.done.wait (%p665_p8), %s184_s5, 256  }
  0x25   : > { %568 = vsyncadd (%p665_p8), %s184_s5, 4294967040  ;;  %s194_s25 = scalar_lea.sflag [#allocation6], %s708_s3  ;;  %s197_s26 = scalar_lea.vmem [#allocation5], %s374_s4 }
  0x26   : > { %570 = dma.done.wait (%p665_p8), %s194_s25, 256  }
  0x27   : > { %572 = vsyncadd (%p665_p8), %s194_s25, 4294967040  ;;  %s376_s27 = sshll.u32 %s708_s3, 3  ;;  %s378_s6 = sshll.u32 %s591_s12, 3  ;;  %v233_v0 = vld [vmem:[%s187_s7] sm:$0xff]  ;;  %v234_v1 = vld [vmem:[%s187_s7 + $0x8] sm:$0xff] }
  0x28   : > { %v235_v2 = vld [vmem:[%s197_s26] sm:$0xff]  ;;  %s255_s16 = scalar_lea.hbm %s762_s2, %s378_s6  ;;  %v236_v3 = vld [vmem:[%s197_s26 + $0x8] sm:$0xff]  ;;  %s223_s18 = scalar_lea.vmem [#allocation7], %s376_s27 }
  0x29   : > { %v237_v4 = vmul.f32 %v235_v2, %v233_v0  ;;  %v238_v5 = vmul.f32 %v236_v3, %v234_v1  ;;  %s257_s20 = sshll.u32 %s223_s18, 4  ;;  %s259_s21 = sshll.u32 %s255_s16, 4  ;;  %s258_s20 = int_to_ptr.vmem [resolvable:$true] %s257_s20  ;;  %s260_s21 = int_to_ptr.hbm [resolvable:$true] %s259_s21 }
  0x2a   : > { %s245_s28 = scalar_lea.sflag [#allocation4], %s708_s3  ;;  %s527_s12 = sshra.s32 %s260_s21, 4  ;;  %s528_s12 = int_to_ptr.hbm [resolvable:$true] %s527_s12 }
  0x2b   : > { %v239_v6 = vadd.f32 %v238_v5, %v237_v4  ;;  %s529_s19 = scalar_lea.hbm %s528_s12, 8  ;;  %s533_s4 = scalar_lea.hbm %s762_s2, 16 }
  0x2c   : > { %p530_p4 = scmp.ne.s32.totalorder %s528_s12, %s529_s19  ;;  %p534_p7 = scmp.lt.s32.totalorder %s528_s12, %s762_s2 }
  0x2d   : > { %243 = vst [vmem:[%s223_s18] sm:$0xff] %v239_v6  ;;  %p535_p8 = scmp.lt.s32.totalorder %s533_s4, %s529_s19 }
  0x2e   : > { %p531_p5 = pnand %p530_p4, %p669_p9 }
  0x2f   : > { %p536_p10 = por %p535_p8, %p534_p7 }
  0x30   : > { %p532_p6 = pneg %p531_p5 }
  0x32   : > { %p537_p13 = pnand %p536_p10, %p532_p6 }
  0x34   : > { %540 = shalt.err (!%p537_p13)
}
  0x35   : > { %387 = dma.vmem_to_hbm [thread:$0]  (%p669_p9), %s258_s20, 128, %s260_s21, %s245_s28  }
  0x36 PF: > { %s271_s3 = sand.u32 1, %s579_s9   ;;  %p397_p0 = pnand %p366_p12, %p676_p11 }
  0x37   : > { %s272_s25 = scalar_lea.sflag [#allocation4], %s271_s3 }
  0x38   : > { %p398_p1 = pneg %p397_p0 }
  0x3a   : > { %574 = dma.done.wait (%p398_p1), %s272_s25, 128  }
  0x3b   : > { %576 = vsyncadd (%p398_p1), %s272_s25, 4294967168  ;;  %s21_s14 = sadd.s32 1, %s599_s14   ;;  %s768_s9 = smov %s583_s10 }
  0x3c   : > { %p18_p2 = scmp.ge.s32.totalorder %s21_s14, 4   ;;  %s769_s10 = smov %s587_s11 }
  0x3d   : > { %s770_s11 = smov %s674_s23  ;;  %s771_s12 = smov %s595_s13 }
  0x3e   : > { %s772_s13 = smov %s774_s17  ;;  %20 = sbr.rel (!%p18_p2) target bundleno = 8 (0x8), region = 90 }
  0x43   :  { %278 = vsyncpa [#allocation3], 1 }
  0x44   :  { %280 = vsyncpa [#allocation3 + $0x1], 1 }
  0x45   :  { %281 = vsyncpa [#allocation6], 1 }
  0x46   :  { %283 = vsyncpa [#allocation6 + $0x1], 1 }
  0x47   :  { %284 = vsyncpa [#allocation4], 1 }
  0x48   :  { %286 = vsyncpa [#allocation4 + $0x1], 1 }

</bundles_post_ra>
